<compile_context>
chip_gen: v5e
topology: v5e:2x2
jax: 0.10.0
libtpu: 0.0.40
codegen_flags: <defaults>
</compile_context>

<pallas_src>
import functools

import jax
import jax.numpy as jnp
from jax import lax
from jax.experimental import pallas as pl
from jax.experimental.pallas import tpu as pltpu


def _vst_clip_loss_kernel(logits_ref, labels_ref, vf_ref, tf_ref, out_ref,
                          acc_ref, *, batch_size: int, block_rows: int,
                          tiles_per_core: int, lambda_contrastive: float):
    t = pl.program_id(1)

    @pl.when(t == 0)
    def _init():
        acc_ref[...] = jnp.zeros_like(acc_ref)

    # Global batch-tile id (unclamped; duplicate/overhang tiles are fully
    # masked out below because their rows are >= batch_size).
    g = pl.program_id(0) * tiles_per_core + t

    logits = logits_ref[...].astype(jnp.float32)                # (TB, C)
    tb, num_cls = logits.shape

    # Validity mask for padded rows (ragged last tile / overhang core tile).
    row_ids = g * block_rows + lax.broadcasted_iota(jnp.int32, (tb, 1), 0)
    valid = row_ids < batch_size                                # (TB, 1)

    # ---- Cross entropy per row, without materializing log-softmax ----
    m = jnp.max(logits, axis=-1, keepdims=True)                 # (TB, 1)
    lse = jnp.log(jnp.sum(jnp.exp(logits - m), axis=-1, keepdims=True))
    labels = labels_ref[...]                                    # (TB, 1) int32
    col_ids = lax.broadcasted_iota(jnp.int32, (tb, num_cls), 1)
    gathered = jnp.sum(jnp.where(col_ids == labels, logits, 0.0),
                       axis=-1, keepdims=True)                  # logits[b, y_b]
    ce_rows = jnp.where(valid, (m + lse) - gathered, 0.0)       # (TB, 1)

    # ---- Contrastive: 1 - cos_sim via dot / (||v|| * ||t||) ----
    vf = vf_ref[...].astype(jnp.float32)                        # (TB, D)
    tf = tf_ref[...].astype(jnp.float32)                        # (TB, D)
    eps = jnp.float32(1e-12)                                    # torch F.normalize eps
    dot = jnp.sum(vf * tf, axis=-1, keepdims=True)              # (TB, 1)
    v_norm = jnp.maximum(jnp.sqrt(jnp.sum(vf * vf, axis=-1, keepdims=True)), eps)
    t_norm = jnp.maximum(jnp.sqrt(jnp.sum(tf * tf, axis=-1, keepdims=True)), eps)
    contr_rows = jnp.where(valid, 1.0 - dot / (v_norm * t_norm), 0.0)

    acc_ref[...] += (jnp.sum(ce_rows, axis=0, keepdims=True)
                     + jnp.float32(lambda_contrastive)
                     * jnp.sum(contr_rows, axis=0, keepdims=True))   # (1, 1)

    @pl.when(t == pl.num_programs(1) - 1)
    def _finalize():
        # Lane-dense (8,128) output slab per core; wrapper reads [c*8, 0].
        out_ref[...] = jnp.broadcast_to(acc_ref[...], out_ref.shape)


def _row_alignment(*dtypes) -> int:
    min_item = min(jnp.dtype(d).itemsize for d in dtypes)
    return 8 if min_item >= 4 else 16          # bf16/f16 native sublane tile is 16


def vst_with_clip_loss(logits, labels, video_features, text_features,
                       lambda_contrastive: float = 0.1, block_rows=None):
    """Pallas implementation of VSTWithClipLoss.forward.

    Args:
      logits:          (B, C) float32 / bfloat16
      labels:          (B,)   integer class indices
      video_features:  (B, D) float32 / bfloat16
      text_features:   (B, D) float32 / bfloat16
      block_rows:      optional batch-tile override
    Returns:
      scalar float32 loss
    """
    B, C = logits.shape
    D = video_features.shape[1]
    labels_2d = labels.astype(jnp.int32).reshape(B, 1)

    itemsize = max(jnp.dtype(logits.dtype).itemsize,
                   jnp.dtype(video_features.dtype).itemsize,
                   jnp.dtype(text_features.dtype).itemsize)
    row_align = _row_alignment(logits.dtype, video_features.dtype,
                               text_features.dtype)

    # Chip-aware VMEM ceiling: ~48 MiB on v7x (64 MiB physical), up to 96 MiB
    # on 128 MiB parts (v5e/v6e).
    try:
        vmem_cap = int(pltpu.get_tpu_info().vmem_capacity_bytes)
    except Exception:
        vmem_cap = 64 << 20
    vmem_ceiling = min((vmem_cap * 3) // 4, 96 << 20)

    # Per-row byte budgets: DMA'd inputs (labels pad to 128 lanes) and the
    # in-kernel f32/i32 temporaries over the (TB,C)/(TB,D) tiles.
    per_row_in = itemsize * (C + 2 * D) + 512
    per_row_tmp = 4 * (4 * C + 2 * D + 16)

    if block_rows is None:
        # Target >= ~8 MiB of streamed input per grid step (amortizes the
        # ~0.35 us per-step overhead even at v7x's 3.2 TB/s HBM), capped so
        # double-buffered inputs + f32 temporaries fit under the VMEM ceiling.
        tb_target = (8 << 20) // max(per_row_in, 1)
        tb_cap = max(row_align,
                     (vmem_ceiling - (6 << 20)) // max(2 * per_row_in + per_row_tmp, 1))
        tb = min(tb_target, tb_cap)
        tb = max(row_align, (tb // row_align) * row_align)
    else:
        tb = int(block_rows)
        if tb < B:
            tb = max(row_align, (tb // row_align) * row_align)
    if tb >= B:
        tb = B                          # single full-extent tile is always legal

    num_tiles = pl.cdiv(B, tb)
    n_cores = 2 if num_tiles >= 2 else 1        # use both v7x TCs when possible
    tiles_per_core = pl.cdiv(num_tiles, n_cores)
    grid = (n_cores, tiles_per_core)

    vmem_need = 2 * tb * per_row_in + tb * per_row_tmp + (4 << 20)
    vmem_limit = int(min(max(vmem_need, 32 << 20), vmem_ceiling))

    def row_block(c, t):
        # Clamp the overhang tile of the last core to a valid block; its rows
        # are masked out inside the kernel.
        g = c * tiles_per_core + t
        return (jnp.minimum(g, num_tiles - 1), 0)

    kernel = functools.partial(
        _vst_clip_loss_kernel,
        batch_size=B, block_rows=tb, tiles_per_core=tiles_per_core,
        lambda_contrastive=float(lambda_contrastive))

    out = pl.pallas_call(
        kernel,
        out_shape=jax.ShapeDtypeStruct((8 * n_cores, 128), jnp.float32),
        grid=grid,
        in_specs=[
            pl.BlockSpec((tb, C), row_block),   # logits
            pl.BlockSpec((tb, 1), row_block),   # labels (int32)
            pl.BlockSpec((tb, D), row_block),   # video features
            pl.BlockSpec((tb, D), row_block),   # text features
        ],
        out_specs=pl.BlockSpec((8, 128), lambda c, t: (c, 0)),  # per-core slab
        scratch_shapes=[pltpu.VMEM((1, 1), jnp.float32)],       # per-core accumulator
        compiler_params=pltpu.CompilerParams(
            dimension_semantics=("parallel", "arbitrary"),
            vmem_limit_bytes=vmem_limit),
    )(logits, labels_2d, video_features, text_features)

    per_core_partials = out[0::8, 0]            # (n_cores,)
    return jnp.sum(per_core_partials) / jnp.float32(B)


def _reference(logits, labels, vf, tf, lam=0.1):
    logprobs = jax.nn.log_softmax(logits.astype(jnp.float32), axis=-1)
    ce = -jnp.mean(jnp.take_along_axis(logprobs, labels[:, None], axis=1))
    vf = vf.astype(jnp.float32)
    tf = tf.astype(jnp.float32)
    vn = vf / jnp.maximum(jnp.linalg.norm(vf, axis=1, keepdims=True), 1e-12)
    tn = tf / jnp.maximum(jnp.linalg.norm(tf, axis=1, keepdims=True), 1e-12)
    contr = jnp.mean(1.0 - jnp.sum(vn * tn, axis=1))
    return ce + lam * contr


if __name__ == "__main__":
    key = jax.random.PRNGKey(0)
    k1, k2, k3, k4, k5, k6, k7, k8 = jax.random.split(key, 8)

    # Small single-tile case.
    B, C, D = 8, 16, 32
    logits = jax.random.normal(k1, (B, C), jnp.float32)
    labels = jax.random.randint(k2, (B,), 0, C, jnp.int32)
    video_features = jax.random.normal(k3, (B, D), jnp.float32)
    text_features = jax.random.normal(k4, (B, D), jnp.float32)

    loss = vst_with_clip_loss(logits, labels, video_features, text_features,
                              lambda_contrastive=0.1)
    jax.block_until_ready(loss)
    ref = _reference(logits, labels, video_features, text_features, 0.1)
    assert jnp.allclose(loss, ref, atol=1e-5, rtol=1e-5), (loss, ref)

    # Multi-tile case with a ragged last tile: exercises pipelining, masking,
    # the dual-core grid split (grid=(2,2)) and the clamped overhang tile.
    B2 = 20
    logits2 = jax.random.normal(k5, (B2, C), jnp.float32)
    labels2 = jax.random.randint(k6, (B2,), 0, C, jnp.int32)
    vf2 = jax.random.normal(k7, (B2, D), jnp.float32)
    tf2 = jax.random.normal(k8, (B2, D), jnp.float32)

    loss2 = vst_with_clip_loss(logits2, labels2, vf2, tf2,
                               lambda_contrastive=0.1, block_rows=8)
    jax.block_until_ready(loss2)
    ref2 = _reference(logits2, labels2, vf2, tf2, 0.1)
    assert jnp.allclose(loss2, ref2, atol=1e-5, rtol=1e-5), (loss2, ref2)

    print("KERNEL_OK")
</pallas_src>

<mosaic_0001>
module attributes {stable_mosaic.version = 11 : i64} {
  func.func @_vst_clip_loss_kernel(%arg0: i32, %arg1: i32, %arg2: memref<8x16xf32, #tpu.memory_space<vmem>>, %arg3: memref<8x1xi32, #tpu.memory_space<vmem>>, %arg4: memref<8x32xf32, #tpu.memory_space<vmem>>, %arg5: memref<8x32xf32, #tpu.memory_space<vmem>>, %arg6: memref<8x128xf32, #tpu.memory_space<vmem>>, %arg7: memref<1x1xf32, #tpu.memory_space<vmem>>) attributes {dimension_semantics = [#tpu.dimension_semantics<parallel>, #tpu.dimension_semantics<arbitrary>], iteration_bounds = array<i64: 1, 1>, scalar_prefetch = 0 : i64, scratch_operands = 1 : i64, tpu.core_type = #tpu.core_type<tc>, window_params = [{transform_indices = @transform_0, window_bounds = array<i64: 8, 16>}, {transform_indices = @transform_1, window_bounds = array<i64: 8, 1>}, {transform_indices = @transform_2, window_bounds = array<i64: 8, 32>}, {transform_indices = @transform_3, window_bounds = array<i64: 8, 32>}, {transform_indices = @transform_4, window_bounds = array<i64: 8, 128>}]} {
    %c0_i32 = arith.constant 0 : i32
    %0 = arith.cmpi eq, %arg1, %c0_i32 : i32
    %1 = arith.extui %0 : i1 to i32
    %c0_i32_0 = arith.constant 0 : i32
    %2 = arith.cmpi ne, %1, %c0_i32_0 : i32
    scf.if %2 {
      %cst_29 = arith.constant 0.000000e+00 : f32
      %68 = vector.broadcast %cst_29 : f32 to vector<1x1xf32>
      %c0_30 = arith.constant 0 : index
      %c0_31 = arith.constant 0 : index
      %69 = vector.load %arg7[%c0_30, %c0_31] : memref<1x1xf32, #tpu.memory_space<vmem>>, vector<1x1xf32>
      tpu.vector_store %arg7[%c0_30, %c0_31], %68 {strides = array<i32>} : memref<1x1xf32, #tpu.memory_space<vmem>>, vector<1x1xf32>,
    } else {
    }
    %c1_i32 = arith.constant 1 : i32
    %3 = arith.muli %arg0, %c1_i32 : i32
    %4 = arith.addi %3, %arg1 : i32
    %c0 = arith.constant 0 : index
    %c0_1 = arith.constant 0 : index
    %5 = vector.load %arg2[%c0, %c0_1] : memref<8x16xf32, #tpu.memory_space<vmem>>, vector<8x16xf32>
    %c8_i32 = arith.constant 8 : i32
    %6 = arith.muli %4, %c8_i32 : i32
    %7 = tpu.iota {dimensions = array<i32: 0>} : vector<8x1xi32>
    %8 = vector.broadcast %6 : i32 to vector<8x1xi32>
    %9 = arith.addi %8, %7 : vector<8x1xi32>
    %c8_i32_2 = arith.constant 8 : i32
    %10 = vector.broadcast %c8_i32_2 : i32 to vector<8x1xi32>
    %11 = arith.cmpi slt, %9, %10 : vector<8x1xi32>
    %cst = arith.constant dense<0xFF800000> : vector<8xf32>
    %12 = vector.multi_reduction <maximumf>, %5, %cst [1] : vector<8x16xf32> to vector<8xf32>
    %13 = vector.shape_cast %12 : vector<8xf32> to vector<8x1xf32>
    %14 = vector.broadcast %13 : vector<8x1xf32> to vector<8x16xf32>
    %15 = arith.subf %5, %14 : vector<8x16xf32>
    %16 = math.exp %15 : vector<8x16xf32>
    %cst_3 = arith.constant dense<0.000000e+00> : vector<8xf32>
    %17 = vector.multi_reduction <add>, %16, %cst_3 [1] : vector<8x16xf32> to vector<8xf32>
    %18 = vector.shape_cast %17 : vector<8xf32> to vector<8x1xf32>
    %19 = math.log %18 : vector<8x1xf32>
    %c0_4 = arith.constant 0 : index
    %c0_5 = arith.constant 0 : index
    %20 = vector.load %arg3[%c0_4, %c0_5] : memref<8x1xi32, #tpu.memory_space<vmem>>, vector<8x1xi32>
    %21 = tpu.iota {dimensions = array<i32: 1>} : vector<8x16xi32>
    %22 = vector.broadcast %20 : vector<8x1xi32> to vector<8x16xi32>
    %23 = arith.cmpi eq, %21, %22 : vector<8x16xi32>
    %cst_6 = arith.constant 0.000000e+00 : f32
    %24 = vector.broadcast %cst_6 : f32 to vector<8x16xf32>
    %25 = arith.select %23, %5, %24 : vector<8x16xi1>, vector<8x16xf32>
    %cst_7 = arith.constant dense<0.000000e+00> : vector<8xf32>
    %26 = vector.multi_reduction <add>, %25, %cst_7 [1] : vector<8x16xf32> to vector<8xf32>
    %27 = vector.shape_cast %26 : vector<8xf32> to vector<8x1xf32>
    %28 = arith.addf %13, %19 : vector<8x1xf32>
    %29 = arith.subf %28, %27 : vector<8x1xf32>
    %cst_8 = arith.constant 0.000000e+00 : f32
    %30 = vector.broadcast %cst_8 : f32 to vector<8x1xf32>
    %31 = arith.select %11, %29, %30 : vector<8x1xi1>, vector<8x1xf32>
    %c0_9 = arith.constant 0 : index
    %c0_10 = arith.constant 0 : index
    %32 = vector.load %arg4[%c0_9, %c0_10] : memref<8x32xf32, #tpu.memory_space<vmem>>, vector<8x32xf32>
    %c0_11 = arith.constant 0 : index
    %c0_12 = arith.constant 0 : index
    %33 = vector.load %arg5[%c0_11, %c0_12] : memref<8x32xf32, #tpu.memory_space<vmem>>, vector<8x32xf32>
    %34 = arith.mulf %32, %33 : vector<8x32xf32>
    %cst_13 = arith.constant dense<0.000000e+00> : vector<8xf32>
    %35 = vector.multi_reduction <add>, %34, %cst_13 [1] : vector<8x32xf32> to vector<8xf32>
    %36 = vector.shape_cast %35 : vector<8xf32> to vector<8x1xf32>
    %37 = arith.mulf %32, %32 : vector<8x32xf32>
    %cst_14 = arith.constant dense<0.000000e+00> : vector<8xf32>
    %38 = vector.multi_reduction <add>, %37, %cst_14 [1] : vector<8x32xf32> to vector<8xf32>
    %39 = vector.shape_cast %38 : vector<8xf32> to vector<8x1xf32>
    %40 = math.sqrt %39 : vector<8x1xf32>
    %cst_15 = arith.constant 9.99999996E-13 : f32
    %41 = vector.broadcast %cst_15 : f32 to vector<8x1xf32>
    %42 = arith.maximumf %40, %41 : vector<8x1xf32>
    %43 = arith.mulf %33, %33 : vector<8x32xf32>
    %cst_16 = arith.constant dense<0.000000e+00> : vector<8xf32>
    %44 = vector.multi_reduction <add>, %43, %cst_16 [1] : vector<8x32xf32> to vector<8xf32>
    %45 = vector.shape_cast %44 : vector<8xf32> to vector<8x1xf32>
    %46 = math.sqrt %45 : vector<8x1xf32>
    %cst_17 = arith.constant 9.99999996E-13 : f32
    %47 = vector.broadcast %cst_17 : f32 to vector<8x1xf32>
    %48 = arith.maximumf %46, %47 : vector<8x1xf32>
    %49 = arith.mulf %42, %48 : vector<8x1xf32>
    %50 = arith.divf %36, %49 : vector<8x1xf32>
    %cst_18 = arith.constant 1.000000e+00 : f32
    %51 = vector.broadcast %cst_18 : f32 to vector<8x1xf32>
    %52 = arith.subf %51, %50 : vector<8x1xf32>
    %cst_19 = arith.constant 0.000000e+00 : f32
    %53 = vector.broadcast %cst_19 : f32 to vector<8x1xf32>
    %54 = arith.select %11, %52, %53 : vector<8x1xi1>, vector<8x1xf32>
    %c0_20 = arith.constant 0 : index
    %c0_21 = arith.constant 0 : index
    %55 = vector.load %arg7[%c0_20, %c0_21] : memref<1x1xf32, #tpu.memory_space<vmem>>, vector<1x1xf32>
    %cst_22 = arith.constant dense<0.000000e+00> : vector<1xf32>
    %56 = vector.multi_reduction <add>, %31, %cst_22 [0] : vector<8x1xf32> to vector<1xf32>
    %57 = vector.shape_cast %56 : vector<1xf32> to vector<1x1xf32>
    %cst_23 = arith.constant dense<0.000000e+00> : vector<1xf32>
    %58 = vector.multi_reduction <add>, %54, %cst_23 [0] : vector<8x1xf32> to vector<1xf32>
    %59 = vector.shape_cast %58 : vector<1xf32> to vector<1x1xf32>
    %cst_24 = arith.constant 1.000000e-01 : f32
    %60 = vector.broadcast %cst_24 : f32 to vector<1x1xf32>
    %61 = arith.mulf %60, %59 : vector<1x1xf32>
    %62 = arith.addf %57, %61 : vector<1x1xf32>
    %63 = arith.addf %55, %62 : vector<1x1xf32>
    %c0_25 = arith.constant 0 : index
    %c0_26 = arith.constant 0 : index
    %64 = vector.load %arg7[%c0_25, %c0_26] : memref<1x1xf32, #tpu.memory_space<vmem>>, vector<1x1xf32>
    tpu.vector_store %arg7[%c0_25, %c0_26], %63 {strides = array<i32>} : memref<1x1xf32, #tpu.memory_space<vmem>>, vector<1x1xf32>,
    %c0_i32_27 = arith.constant 0 : i32
    %65 = arith.cmpi eq, %arg1, %c0_i32_27 : i32
    %66 = arith.extui %65 : i1 to i32
    %c0_i32_28 = arith.constant 0 : i32
    %67 = arith.cmpi ne, %66, %c0_i32_28 : i32
    scf.if %67 {
      %c0_29 = arith.constant 0 : index
      %c0_30 = arith.constant 0 : index
      %68 = vector.load %arg7[%c0_29, %c0_30] : memref<1x1xf32, #tpu.memory_space<vmem>>, vector<1x1xf32>
      %69 = vector.shape_cast %68 : vector<1x1xf32> to vector<1x1xf32>
      %70 = vector.broadcast %69 : vector<1x1xf32> to vector<8x128xf32>
      %c0_31 = arith.constant 0 : index
      %c0_32 = arith.constant 0 : index
      %71 = vector.load %arg6[%c0_31, %c0_32] : memref<8x128xf32, #tpu.memory_space<vmem>>, vector<8x128xf32>
      tpu.vector_store %arg6[%c0_31, %c0_32], %70 {strides = array<i32>} : memref<8x128xf32, #tpu.memory_space<vmem>>, vector<8x128xf32>,
    } else {
    }
    return
  }
  func.func @transform_0(%arg0: i32, %arg1: i32) -> (i32, i32) {
    %c1_i32 = arith.constant 1 : i32
    %0 = arith.muli %arg0, %c1_i32 : i32
    %1 = arith.addi %0, %arg1 : i32
    %c0_i32 = arith.constant 0 : i32
    %2 = arith.minsi %1, %c0_i32 : i32
    %c0_i32_0 = arith.constant 0 : i32
    %c0_i32_1 = arith.constant 0 : i32
    return %2, %c0_i32_0 : i32, i32
  }
  func.func @transform_1(%arg0: i32, %arg1: i32) -> (i32, i32) {
    %c1_i32 = arith.constant 1 : i32
    %0 = arith.muli %arg0, %c1_i32 : i32
    %1 = arith.addi %0, %arg1 : i32
    %c0_i32 = arith.constant 0 : i32
    %2 = arith.minsi %1, %c0_i32 : i32
    %c0_i32_0 = arith.constant 0 : i32
    %c0_i32_1 = arith.constant 0 : i32
    return %2, %c0_i32_0 : i32, i32
  }
  func.func @transform_2(%arg0: i32, %arg1: i32) -> (i32, i32) {
    %c1_i32 = arith.constant 1 : i32
    %0 = arith.muli %arg0, %c1_i32 : i32
    %1 = arith.addi %0, %arg1 : i32
    %c0_i32 = arith.constant 0 : i32
    %2 = arith.minsi %1, %c0_i32 : i32
    %c0_i32_0 = arith.constant 0 : i32
    %c0_i32_1 = arith.constant 0 : i32
    return %2, %c0_i32_0 : i32, i32
  }
  func.func @transform_3(%arg0: i32, %arg1: i32) -> (i32, i32) {
    %c1_i32 = arith.constant 1 : i32
    %0 = arith.muli %arg0, %c1_i32 : i32
    %1 = arith.addi %0, %arg1 : i32
    %c0_i32 = arith.constant 0 : i32
    %2 = arith.minsi %1, %c0_i32 : i32
    %c0_i32_0 = arith.constant 0 : i32
    %c0_i32_1 = arith.constant 0 : i32
    return %2, %c0_i32_0 : i32, i32
  }
  func.func @transform_4(%arg0: i32, %arg1: i32) -> (i32, i32) {
    %c0_i32 = arith.constant 0 : i32
    %c0_i32_0 = arith.constant 0 : i32
    return %arg0, %c0_i32 : i32, i32
  }
}

</mosaic_0001>

<bundles_post_ra>
// kernel: tpu_custom_call.1
= control target key start
LH: loop header
LB: loop body
LE: loop exit
PB: predicated region body
PF: predicated region fallthrough
CT: control target
= control target key end

     0   :  { %9 = vsyncpa [#allocation4], 0  ;;  %s432_s0 = inlined_call_operand.vmem [shape: f32[8,16], index: 0, kind: input, shape index: {}]   ;;  %s433_s1 = inlined_call_operand.vmem [shape: s32[8,1], index: 1, kind: input, shape index: {}]   ;;  %s434_s2 = inlined_call_operand.hbm [shape: f32[8,32], index: 2, kind: input, shape index: {}]   ;;  %s435_s3 = inlined_call_operand.hbm [shape: f32[8,32], index: 3, kind: input, shape index: {}]   ;;  %s436_s4 = inlined_call_operand.hbm [shape: f32[8,128], index: 4, kind: output, shape index: {}]  }
   0x1   :  { %10 = vsyncpa [#allocation7], 0 }
   0x2   :  { %11 = vsyncpa [#allocation5], 0  ;;  %s46_s17 = sshll.u32 %s434_s2, 4  ;;  %s375_s18 = smov [#allocation3]   ;;  %s47_s17 = int_to_ptr.hbm [resolvable:$true] %s46_s17 }
   0x3   :  { %s48_s19 = sshll.u32 %s375_s18, 4  ;;  %s62_s22 = sshll.u32 %s435_s3, 4  ;;  %s49_s19 = int_to_ptr.vmem [resolvable:$true] %s48_s19  ;;  %s63_s22 = int_to_ptr.hbm [resolvable:$true] %s62_s22 }
   0x4   :  { %51 = dma.hbm_to_vmem [thread:$0]  %s47_s17, 128, %s49_s19, [#allocation4]  }
   0x5   :  { %s376_s23 = smov [#allocation6]  }
   0x6   :  { %s64_s24 = sshll.u32 %s376_s23, 4  ;;  %s65_s24 = int_to_ptr.vmem [resolvable:$true] %s64_s24 }
   0x7   :  { %67 = dma.hbm_to_vmem [thread:$0]  %s63_s22, 128, %s65_s24, [#allocation7]  }
   0x8   :  { %369 = dma.done.wait [#allocation4], 128  }
   0x9   :  { %370 = vsyncadd [#allocation4], 4294967168 }
   0xa   :  { %371 = dma.done.wait [#allocation7], 128  }
   0xb   :  { %372 = vsyncadd [#allocation7], 4294967168  ;;  %v377_v0 = vmov 0   ;;  %vm130_vm0 = vcmask 130048   ;;  %v123_v1 = vld [vmem:[%s432_s0] sm:$0xff]  ;;  %v157_v2 = vld [vmem:[#allocation6] sm:$0xff]  ;;  %v143_v18 = vlaneseq }
   0xc   :  { %283 = vset.pattern.permute.xlu1 %v377_v0  ;;  %284 = vset.pattern.permute.xlu2 %v377_v0  ;;  %vm159_vm1 = vcmask 261120   ;;  %v156_v3 = vld [vmem:[#allocation3] sm:$0xff]  ;;  %v131_v4 = vsel %vm130_vm0, %v123_v1, -inf  ;;  %v180_v5 = vmul.f32 %v157_v2, %v157_v2  ;;  %vm120_vm7 = vcmask 0   ;;  %s379_s0 = smov [#allocation8]   ;;  %s251_s29 = sshll.u32 %s436_s4, 4  ;;  %s252_s29 = int_to_ptr.hbm [resolvable:$true] %s251_s29 }
   0xd   :  { %285 = vset.pattern.permute.xlu0 %v377_v0  ;;  %v163_v7 = vmul.f32 %v156_v3, %v156_v3  ;;  %v142_v9 = vld [vmem:[%s433_s1] sm:$0xff]  ;;  %v158_v15 = vmul.f32 %v157_v2, %v156_v3  ;;  %v144_v19 = vand.u32 127, %v143_v18  ;;  %v378_v50 = vmov 0.0   ;;  %s249_s1 = sshll.u32 %s379_s0, 4  ;;  %s250_s1 = int_to_ptr.vmem [resolvable:$true] %s249_s1 }
   0xe   :  { %132 = vmax.xlane.f32.xlu0 %v131_v4  ;;  %v181_v6 = vsel %vm159_vm1, %v180_v5, 0.0  ;;  %121 = vst.msk [vmem:[#allocation2] sm:$0x1] %vm120_vm7, %v378_v50 }
   0xf   :  { %182 = vadd.xlane.f32.xlu1 %v181_v6  ;;  %v164_v8 = vsel %vm159_vm1, %v163_v7, 0.0  ;;  %v160_v17 = vsel %vm159_vm1, %v158_v15, 0.0 }
  0x16   :  { %165 = vadd.xlane.f32.xlu0 %v164_v8 }
  0x28   :  { %146 = vperm.xlu1 %283, %v142_v9  }
  0x81   :  { %v420_v10 = vpop.xlane.xlu0 %132 }
  0x82   :  { %v134_v11 = vsub.f32 %v123_v1, %v420_v10  ;;  %v183_v16 = vpop.xlane.xlu1 %182 }
  0x83   :  { %vm191_vm5 = vcmp.eq.f32.partialorder %v183_v16, inf  ;;  %v194_v41 = vand.u32 2147483648, %v183_v16  ;;  %vm193_vm6 = vcmp.eq.f32.partialorder %v183_v16, 0.0 }
  0x84   :  { %v135_v12 = vmul.f32 1.442695, %v134_v11 }
  0x86   :  { %287 = vpow2.f32 %v135_v12 }
  0x89   :  { %v166_v23 = vpop.xlane.xlu0 %165 }
  0x8a   :  { %289 = vrsqrt.f32 %v166_v23  ;;  %vm174_vm3 = vcmp.eq.f32.partialorder %v166_v23, inf  ;;  %v177_v38 = vand.u32 2147483648, %v166_v23  ;;  %vm176_vm4 = vcmp.eq.f32.partialorder %v166_v23, 0.0 }
  0x8b   :  { %291 = vrsqrt.f32 %v183_v16 }
  0x8c   :  { %v288_v13 = vpop.eup %287 }
  0x8d   :  { %v137_v14 = vsel %vm130_vm0, %v288_v13, 0.0 }
  0x8e   :  { %138 = vadd.xlane.f32.xlu2 %v137_v14 }
  0x90   :  { %v290_v24 = vpop.eup %289 }
  0x91   :  { %v292_v25 = vpop.eup %291  ;;  %v168_v26 = vmul.f32 %v290_v24, %v166_v23 }
  0x92   :  { %v185_v27 = vmul.f32 %v292_v25, %v183_v16 }
  0x93   :  { %v169_v28 = vmul.f32 %v290_v24, %v168_v26 }
  0x94   :  { %v186_v29 = vmul.f32 %v292_v25, %v185_v27 }
  0x95   :  { %v170_v30 = vmul.f32 0.5, %v169_v28 }
  0x96   :  { %161 = vadd.xlane.f32.xlu2 %v160_v17  ;;  %v187_v31 = vmul.f32 0.5, %v186_v29  ;;  %v215_v17 = vld [vmem:[#allocation2] sm:$0x1] }
  0x97   :  { %v171_v32 = vsub.f32 1.5, %v170_v30 }
  0x98   :  { %v188_v33 = vsub.f32 1.5, %v187_v31 }
  0x99   :  { %v172_v34 = vmul.f32 %v290_v24, %v171_v32 }
  0x9a   :  { %v147_v20 = vpop.permute.xlu1 %146  ;;  %v189_v35 = vmul.f32 %v292_v25, %v188_v33 }
  0x9b   :  { %vm148_vm2 = vcmp.eq.s32.totalorder %v144_v19, %v147_v20  ;;  %v173_v36 = vmul.f32 %v172_v34, %v166_v23 }
  0x9c   :  { %v149_v21 = vsel %vm148_vm2, %v123_v1, 0.0  ;;  %v190_v37 = vmul.f32 %v189_v35, %v183_v16 }
  0x9d   :  { %v150_v22 = vsel %vm130_vm0, %v149_v21, 0.0  ;;  %v175_v39 = vsel %vm174_vm3, %v166_v23, %v173_v36 }
  0x9e   :  { %151 = vadd.xlane.f32.xlu0 %v150_v22  ;;  %v192_v40 = vsel %vm191_vm5, %v183_v16, %v190_v37  ;;  %v178_v42 = vsel %vm176_vm4, %v177_v38, %v175_v39 }
  0x9f   :  { %v195_v43 = vsel %vm193_vm6, %v194_v41, %v192_v40  ;;  %v179_v44 = vmax.f32 %v178_v42, 1e-12 }
  0xa0   :  { %v196_v45 = vmax.f32 %v195_v43, 1e-12 }
  0xa2   :  { %v197_v46 = vmul.f32 %v196_v45, %v179_v44 }
  0xa4   :  { %293 = vrcp.f32 %v197_v46  ;;  %v209_v54 = vand.u32 2147483648, %v197_v46  ;;  %vm203_vm9 = vweird.f32 %v197_v46  ;;  %v207_v55 = vand.u32 2147483647, %v197_v46 }
  0xa6   :  { %v210_v57 = vor.u32 1.1754944e-38, %v209_v54  ;;  %vm208_vm11 = vcmp.eq.f32.partialorder %v207_v55, 8.507059e+37 }
  0xaa   :  { %v294_v47 = vpop.eup %293 }
  0xab   :  { %v199_v48 = vmul.f32 %v294_v47, %v197_v46  ;;  %vm204_vm8 = vweird.f32 %v294_v47 }
  0xac   :  { %vm205_vm10 = vmor %vm203_vm9, %vm204_vm8 }
  0xad   :  { %v200_v49 = vsub.f32 1.0, %v199_v48 }
  0xaf   :  { %v201_v51 = vmul.f32 %v294_v47, %v200_v49 }
  0xb1   :  { %v202_v53 = vadd.f32 %v294_v47, %v201_v51 }
  0xb3   :  { %v206_v56 = vsel %vm205_vm10, %v294_v47, %v202_v53 }
  0xb4   :  { %v211_v59 = vsel %vm208_vm11, %v210_v57, %v206_v56 }
 0x101   :  { %v139_v52 = vpop.xlane.xlu2 %138 }
 0x102   :  { %295 = vlog2.f32 %v139_v52 }
 0x108   :  { %v296_v60 = vpop.eup %295 }
 0x109   :  { %v162_v58 = vpop.xlane.xlu2 %161  ;;  %v141_v63 = vmul.f32 0.6931472, %v296_v60 }
 0x10a   :  { %v212_v61 = vmul.f32 %v211_v59, %v162_v58 }
 0x10b   :  { %v153_v2 = vadd.f32 %v141_v63, %v420_v10 }
 0x10c   :  { %v213_v62 = vsub.f32 1.0, %v212_v61 }
 0x10e   :  { %v222_v0 = vrot.slane %v213_v62, 4 }
 0x110   :  { %v223_v1 = vadd.f32 %v222_v0, %v213_v62 }
 0x111   :  { %v152_v4 = vpop.xlane.xlu0 %151 }
 0x112   :  { %v224_v3 = vrot.slane %v223_v1, 2  ;;  %v154_v5 = vsub.f32 %v153_v2, %v152_v4 }
 0x114   :  { %v225_v6 = vadd.f32 %v224_v3, %v223_v1  ;;  %v216_v7 = vrot.slane %v154_v5, 4 }
 0x116   :  { %v226_v8 = vrot.slane %v225_v6, 1  ;;  %v217_v9 = vadd.f32 %v216_v7, %v154_v5 }
 0x118   :  { %v218_v11 = vrot.slane %v217_v9, 2  ;;  %v227_v12 = vadd.f32 %v226_v8, %v225_v6 }
 0x11a   :  { %v219_v13 = vadd.f32 %v218_v11, %v217_v9  ;;  %v228_v15 = vmul.f32 0.1, %v227_v12 }
 0x11c   :  { %v220_v14 = vrot.slane %v219_v13, 1 }
 0x11e   :  { %v221_v16 = vadd.f32 %v220_v14, %v219_v13 }
 0x120   :  { %v229_v18 = vadd.f32 %v228_v15, %v221_v16 }
 0x122   :  { %v230_v19 = vadd.f32 %v229_v18, %v215_v17 }
 0x124   :  { %232 = vst.msk [vmem:[#allocation2] sm:$0x1] %vm120_vm7, %v230_v19 }
 0x12b   :  { %v286_v20 = vld [vmem:[#allocation2] ss:$0 sm:$0xff] }
 0x12c   :  { %240 = vperm.xlu2 %284, %v286_v20  }
 0x186   :  { %v241_v10 = vpop.permute.xlu2 %240 }
 0x187   :  { %243 = vst [vmem:[#allocation8] sm:$0xff] %v241_v10 }
 0x188   :  { %254 = dma.vmem_to_hbm [thread:$0]  %s250_s1, 128, %s252_s29, [#allocation5]  }
 0x189   :  { %373 = dma.done.wait [#allocation5], 128  }
 0x18a   :  { %374 = vsyncadd [#allocation5], 4294967168 }
 0x18b   :  { %259 = vsyncpa [#allocation4], 1 }
 0x18c   :  { %260 = vsyncpa [#allocation7], 1 }
 0x18d   :  { %261 = vsyncpa [#allocation5], 1 }

</bundles_post_ra>
